<compile_context>
chip_gen: v5e
topology: v5e:2x2
jax: 0.10.0
libtpu: 0.0.40
codegen_flags: <defaults>
</compile_context>

<pallas_src>
import functools
import math

import jax
import jax.numpy as jnp
from jax.experimental import pallas as pl
from jax.experimental.pallas import tpu as pltpu

MIB = 1024 * 1024


# ---------------------------------------------------------------------------
# helpers
# ---------------------------------------------------------------------------
def _round_up(v, m):
    return -(-v // m) * m


def _sublane_pack(dtype):
    # packed sublane multiple: f32 -> 8, bf16 -> 16, int8/fp8 -> 32
    return max(8, 32 // jnp.dtype(dtype).itemsize)


def _vmem_capacity_bytes():
    try:
        cap = getattr(pltpu.get_tpu_info(), "vmem_capacity_bytes", None)
        if cap and int(cap) >= 16 * MIB:
            return int(cap)
    except Exception:
        pass
    return 64 * MIB  # conservative default (v7x per-TensorCore)


def _sanitize_tile(tile, total, sub):
    tile = int(min(tile, total))
    if tile < total:
        tile = max(sub, (tile // sub) * sub)  # dtype-aware sublane multiple
        tile = min(tile, total)
    return tile


# ---------------------------------------------------------------------------
# Fused fast path: x resident in VMEM, single kernel (reduce -> MLP -> scale).
# ---------------------------------------------------------------------------
def _se_fused_kernel(x_ref, w1t_ref, w2t_ref, o_ref, *, inv_t):
    x = x_ref[...]                                            # (T, B, C)
    y = jnp.sum(x, axis=0, dtype=jnp.float32) * inv_t         # (B, C) f32 mean
    wdt = w1t_ref.dtype                                       # native weight dtype
    h = jnp.dot(y.astype(wdt), w1t_ref[...],
                preferred_element_type=jnp.float32)           # (B, H)
    h = jnp.maximum(h, 0.0)                                   # ReLU
    s = jnp.dot(h.astype(wdt), w2t_ref[...],
                preferred_element_type=jnp.float32)           # (B, C)
    g = jax.nn.sigmoid(s).astype(x.dtype)                     # gate in x.dtype
    o_ref[...] = x * g[None, :, :]


# ---------------------------------------------------------------------------
# Streaming pass 1: per-tile partial time-sums (fully parallel grid).
# ---------------------------------------------------------------------------
def _se_partial_kernel(x_ref, p_ref, *, total_t, tile_t, psub, has_remainder):
    w = x_ref.shape[-1]

    def reduce_tile(xv):
        if psub > 1:
            # (tile_t, W) -> (tile_t//psub, psub, W): pure VPU adds across slabs;
            # the final psub->1 cross-sublane reduce is deferred to plain JAX.
            xv = xv.reshape(tile_t // psub, psub, w)
            return jnp.sum(xv, axis=0, dtype=jnp.float32)
        return jnp.sum(xv, axis=0, keepdims=True, dtype=jnp.float32)

    x = x_ref[...]                                            # (tile_t, W) native dtype
    if has_remainder:
        t = pl.program_id(0)
        nt = pl.num_programs(0)

        @pl.when(t == nt - 1)
        def _ragged():
            rows = jax.lax.broadcasted_iota(jnp.int32, x.shape, 0)
            valid = total_t - t * tile_t
            p_ref[...] = reduce_tile(jnp.where(rows < valid, x, jnp.zeros_like(x)))

        @pl.when(t != nt - 1)
        def _full():
            p_ref[...] = reduce_tile(x)
    else:
        p_ref[...] = reduce_tile(x)


# ---------------------------------------------------------------------------
# Streaming pass 2: lane-dense scale by the resident gate (already x.dtype).
# ---------------------------------------------------------------------------
def _se_apply_kernel(g_ref, x_ref, o_ref):
    o_ref[...] = x_ref[...] * g_ref[...]


def _se_streaming(x, w1, w2, tile_rows, cap):
    T, B, C = x.shape
    BC = B * C
    itemsize = jnp.dtype(x.dtype).itemsize
    sub = _sublane_pack(x.dtype)

    if cap >= 100 * MIB:                # v5e / v6e: 128 MiB physical VMEM
        target_tile, vmem_limit = 4 * MIB, 64 * MIB
    else:                               # v7x: 64 MiB per TensorCore
        target_tile, vmem_limit = 2 * MIB, 32 * MIB

    x2 = x.reshape(T, BC)               # lane-dense fold (contiguous, free)
    row_bytes = _round_up(BC, 128) * itemsize
    auto_rows = max(sub, target_tile // max(row_bytes, 1))
    t1 = _sanitize_tile(tile_rows if tile_rows is not None else auto_rows, T, sub)
    n1 = pl.cdiv(T, t1)
    has_rem = (T % t1) != 0
    psub = sub if (t1 % sub == 0) else 1

    # ---------------- pass 1: partial sums over T ----------------
    partials = pl.pallas_call(
        functools.partial(_se_partial_kernel, total_t=T, tile_t=t1,
                          psub=psub, has_remainder=has_rem),
        out_shape=jax.ShapeDtypeStruct((n1 * psub, BC), jnp.float32),
        grid=(n1,),
        in_specs=[pl.BlockSpec((t1, BC), lambda t: (t, 0))],
        out_specs=pl.BlockSpec((psub, BC), lambda t: (t, 0)),
        compiler_params=pltpu.CompilerParams(
            dimension_semantics=("parallel",),   # shards across v7x's 2 TCs
            vmem_limit_bytes=vmem_limit,
        ),
    )(x2)

    # Tiny bottleneck MLP in plain JAX (negligible work, keeps kernels lane-dense).
    y = (jnp.sum(partials, axis=0) * (1.0 / T)).reshape(B, C)          # f32 mean
    h = jnp.maximum(jnp.dot(y, jnp.transpose(w1).astype(jnp.float32)), 0.0)
    g = jax.nn.sigmoid(jnp.dot(h, jnp.transpose(w2).astype(jnp.float32)))
    gate2 = g.astype(x.dtype).reshape(1, BC)     # gate emitted in x.dtype

    # ---------------- pass 2: lane-dense scale over T ----------------
    t2 = _sanitize_tile(tile_rows if tile_rows is not None else auto_rows, T, sub)
    n2 = pl.cdiv(T, t2)
    # TODO(synk): if B*C % 128 != 0 the output stores lower to masked vst.msk;
    # a lane-padded fold would make them unmasked at the cost of a pad/unpad copy.
    out2 = pl.pallas_call(
        _se_apply_kernel,
        out_shape=jax.ShapeDtypeStruct((T, BC), x.dtype),
        grid=(n2,),
        in_specs=[
            pl.BlockSpec((1, BC), lambda t: (0, 0)),     # gate: resident in VMEM
            pl.BlockSpec((t2, BC), lambda t: (t, 0)),    # x tile
        ],
        out_specs=pl.BlockSpec((t2, BC), lambda t: (t, 0)),
        compiler_params=pltpu.CompilerParams(
            dimension_semantics=("parallel",),
            vmem_limit_bytes=vmem_limit,
        ),
    )(gate2, x2)

    return out2.reshape(T, B, C)


# ---------------------------------------------------------------------------
# Public wrapper / dispatcher
# ---------------------------------------------------------------------------
def se_attention(x, w1, w2, *, tile_rows=None, force_two_pass=False):
    """x: (T, B, C); w1: (H, C) = fc1.weight; w2: (C, H) = fc2.weight."""
    T, B, C = x.shape
    itemsize = jnp.dtype(x.dtype).itemsize
    sub = _sublane_pack(x.dtype)
    cap = _vmem_capacity_bytes()

    # Padded VMEM footprint of a (T, B, C) block (last two dims pad to tile).
    padded_x = T * _round_up(B, sub) * _round_up(C, 128) * itemsize
    w_bytes = (w1.size + w2.size) * jnp.dtype(w1.dtype).itemsize
    fused_need = 2 * padded_x + 2 * w_bytes + 2 * MIB
    fused_budget = min(cap // 2, 48 * MIB)

    if (not force_two_pass) and tile_rows is None and fused_need <= fused_budget:
        w1t = jnp.transpose(w1)   # (C, H)
        w2t = jnp.transpose(w2)   # (H, C)
        vmem_limit = min((cap * 3) // 4, max(32 * MIB, fused_need + 8 * MIB))
        return pl.pallas_call(
            functools.partial(_se_fused_kernel, inv_t=1.0 / T),
            out_shape=jax.ShapeDtypeStruct((T, B, C), x.dtype),
            compiler_params=pltpu.CompilerParams(vmem_limit_bytes=vmem_limit),
        )(x, w1t, w2t)

    return _se_streaming(x, w1, w2, tile_rows, cap)


# ---------------------------------------------------------------------------
# Reference / init helpers
# ---------------------------------------------------------------------------
def xavier_uniform(key, shape, dtype=jnp.float32):
    # matches torch.nn.init.xavier_uniform_ for a Linear weight (out, in)
    fan_out, fan_in = shape
    bound = math.sqrt(6.0 / (fan_in + fan_out))
    return jax.random.uniform(key, shape, dtype=dtype, minval=-bound, maxval=bound)


def se_attention_ref(x, w1, w2):
    # pure-JAX reference mirroring the PyTorch forward exactly
    xp = jnp.transpose(x, (1, 2, 0))            # (B, C, T)
    y = jnp.mean(xp, axis=-1)                   # (B, C)
    y = jnp.maximum(y @ w1.T, 0.0)              # (B, H)
    y = jax.nn.sigmoid(y @ w2.T)                # (B, C)
    xp = xp * y[:, :, None]                     # (B, C, T)
    return jnp.transpose(xp, (2, 0, 1))         # (T, B, C)


if __name__ == "__main__":
    # small shapes consistent with the module: channel=64, reduction=8
    T, B, C, reduction = 20, 4, 64, 8
    H = C // reduction

    key = jax.random.PRNGKey(0)
    kx, k1, k2 = jax.random.split(key, 3)

    x = jax.random.normal(kx, (T, B, C), dtype=jnp.float32)
    w1 = xavier_uniform(k1, (H, C))   # fc1.weight (no bias)
    w2 = xavier_uniform(k2, (C, H))   # fc2.weight (no bias)

    ref = se_attention_ref(x, w1, w2)

    # Fused VMEM-resident path, ragged multi-tile streaming path (3 T-tiles,
    # ragged last tile), and single-tile streaming path.
    out_fused = jax.block_until_ready(se_attention(x, w1, w2))
    out_tiled = jax.block_until_ready(se_attention(x, w1, w2, tile_rows=8))
    out_stream = jax.block_until_ready(se_attention(x, w1, w2, force_two_pass=True))

    for name, out in (("fused", out_fused), ("tiled", out_tiled), ("stream", out_stream)):
        assert out.shape == (T, B, C), f"{name}: bad shape {out.shape}"
        assert jnp.allclose(out, ref, atol=1e-5, rtol=1e-5), f"{name} mismatch vs reference"

    print("KERNEL_OK")
</pallas_src>

<mosaic_0001>
module attributes {stable_mosaic.version = 11 : i64} {
  func.func @_se_fused_kernel(%arg0: memref<20x4x64xf32, #tpu.memory_space<vmem>>, %arg1: memref<64x8xf32, #tpu.memory_space<vmem>>, %arg2: memref<8x64xf32, #tpu.memory_space<vmem>>, %arg3: memref<20x4x64xf32, #tpu.memory_space<vmem>>) attributes {dimension_semantics = [], scalar_prefetch = 0 : i64, scratch_operands = 0 : i64, tpu.core_type = #tpu.core_type<tc>} {
    %c0 = arith.constant 0 : index
    %c0_0 = arith.constant 0 : index
    %c0_1 = arith.constant 0 : index
    %0 = vector.load %arg0[%c0, %c0_0, %c0_1] : memref<20x4x64xf32, #tpu.memory_space<vmem>>, vector<20x4x64xf32>
    %cst = arith.constant dense<0.000000e+00> : vector<4x64xf32>
    %1 = vector.multi_reduction <add>, %0, %cst [0] : vector<20x4x64xf32> to vector<4x64xf32>
    %cst_2 = arith.constant 5.000000e-02 : f32
    %2 = vector.broadcast %cst_2 : f32 to vector<4x64xf32>
    %3 = arith.mulf %1, %2 : vector<4x64xf32>
    %c0_3 = arith.constant 0 : index
    %c0_4 = arith.constant 0 : index
    %4 = vector.load %arg1[%c0_3, %c0_4] : memref<64x8xf32, #tpu.memory_space<vmem>>, vector<64x8xf32>
    %cst_5 = arith.constant dense<0.000000e+00> : vector<4x8xf32>
    %5 = tpu.matmul %3, %4, %cst_5 {dimension_numbers = #tpu.dot_dimension_numbers<[1], [0], [0], [1], [0, 0, 1, 1], [], []>} : vector<4x64xf32>, vector<64x8xf32>, vector<4x8xf32> -> vector<4x8xf32>
    %cst_6 = arith.constant 0.000000e+00 : f32
    %6 = vector.broadcast %cst_6 : f32 to vector<4x8xf32>
    %7 = arith.maximumf %5, %6 : vector<4x8xf32>
    %c0_7 = arith.constant 0 : index
    %c0_8 = arith.constant 0 : index
    %8 = vector.load %arg2[%c0_7, %c0_8] : memref<8x64xf32, #tpu.memory_space<vmem>>, vector<8x64xf32>
    %cst_9 = arith.constant dense<0.000000e+00> : vector<4x64xf32>
    %9 = tpu.matmul %7, %8, %cst_9 {dimension_numbers = #tpu.dot_dimension_numbers<[1], [0], [0], [1], [0, 0, 1, 1], [], []>} : vector<4x8xf32>, vector<8x64xf32>, vector<4x64xf32> -> vector<4x64xf32>
    %10 = arith.negf %9 : vector<4x64xf32>
    %11 = math.exp %10 : vector<4x64xf32>
    %cst_10 = arith.constant 1.000000e+00 : f32
    %12 = vector.broadcast %cst_10 : f32 to vector<4x64xf32>
    %13 = arith.addf %12, %11 : vector<4x64xf32>
    %14 = arith.divf %12, %13 : vector<4x64xf32>
    %15 = vector.shape_cast %14 : vector<4x64xf32> to vector<1x4x64xf32>
    %16 = vector.broadcast %15 : vector<1x4x64xf32> to vector<20x4x64xf32>
    %17 = arith.mulf %0, %16 : vector<20x4x64xf32>
    %c0_11 = arith.constant 0 : index
    %c0_12 = arith.constant 0 : index
    %c0_13 = arith.constant 0 : index
    %18 = vector.load %arg3[%c0_11, %c0_12, %c0_13] : memref<20x4x64xf32, #tpu.memory_space<vmem>>, vector<20x4x64xf32>
    tpu.vector_store %arg3[%c0_11, %c0_12, %c0_13], %17 {strides = array<i32>} : memref<20x4x64xf32, #tpu.memory_space<vmem>>, vector<20x4x64xf32>,
    return
  }
}

</mosaic_0001>

<bundles_post_ra>
// kernel: tpu_custom_call.1
= control target key start
LH: loop header
LB: loop body
LE: loop exit
PB: predicated region body
PF: predicated region fallthrough
CT: control target
= control target key end

     0   :  { %8 = vsyncpa [#allocation3], 0  ;;  %s474_s0 = inlined_call_operand.hbm [shape: f32[20,4,64], index: 0, kind: input, shape index: {}]   ;;  %s475_s1 = inlined_call_operand.vmem [shape: f32[64,8], index: 1, kind: input, shape index: {}]   ;;  %s476_s2 = inlined_call_operand.vmem [shape: f32[8,64], index: 2, kind: input, shape index: {}]   ;;  %s477_s3 = inlined_call_operand.hbm [shape: f32[20,4,64], index: 3, kind: output, shape index: {}]  }
   0x1   :  { %9 = vsyncpa [#allocation4], 0  ;;  %s14_s14 = sshll.u32 %s474_s0, 4  ;;  %s291_s15 = smov [#allocation2]   ;;  %s15_s14 = int_to_ptr.hbm [resolvable:$true] %s14_s14 }
   0x2   :  { %s16_s16 = sshll.u32 %s291_s15, 4  ;;  %s292_s17 = smov 64   ;;  %s17_s16 = int_to_ptr.vmem [resolvable:$true] %s16_s16 }
   0x3   :  { %s293_s18 = smov 4  }
   0x4   :  { %22 = dma.hbm_to_vmem [thread:$0]  %s15_s14, 1280, %s17_s16, [#allocation3], %s292_s17, %s292_s17, %s293_s18  }
   0x5   :  { %287 = dma.done.wait [#allocation3], 1280  }
   0x6   :  { %288 = vsyncadd [#allocation3], 4294966016  ;;  %v99_v0 = vld [vmem:[%s475_s1 + $0x38] sm:$0xff]  ;;  %v98_v1 = vld [vmem:[%s475_s1 + $0x30] sm:$0xff]  ;;  %vm51_vm0 = vcmask 519168   ;;  %vm100_vm1 = vcmask 523264  }
   0x7   :  { %112 = vmatpush.msra.mxu0 %v99_v0  ;;  %v97_v2 = vld [vmem:[%s475_s1 + $0x28] sm:$0xff]  ;;  %v96_v3 = vld [vmem:[%s475_s1 + $0x20] sm:$0xff]  ;;  %v95_v4 = vld [vmem:[%s475_s1 + $0x18] sm:$0xff]  ;;  %vm126_vm2 = vcmask 64512   ;;  %s215_s11 = sshll.u32 %s477_s3, 4  ;;  %s216_s11 = int_to_ptr.hbm [resolvable:$true] %s215_s11 }
   0x8   :  { %v336_v5 = vld [vmem:[#allocation2] sm:$0xf]  ;;  %v338_v6 = vld [vmem:[#allocation2 + $0x4] sm:$0xf]  ;;  %v340_v7 = vld [vmem:[#allocation2 + $0x8] sm:$0xf] }
   0x9   :  { %113 = vmatpush.msra.mxu0 %v98_v1  ;;  %v94_v8 = vld [vmem:[%s475_s1 + $0x10] sm:$0xff]  ;;  %v345_v9 = vld [vmem:[#allocation2 + $0xc] sm:$0xf]  ;;  %v52_v10 = vsel %vm51_vm0, %v336_v5, 0.0  ;;  %v53_v11 = vsel %vm51_vm0, %v338_v6, 0.0  ;;  %v55_v12 = vsel %vm51_vm0, %v340_v7, 0.0 }
   0xa   :  { %v93_v13 = vld [vmem:[%s475_s1 + $0x8] sm:$0xff]  ;;  %v356_v14 = vld [vmem:[#allocation2 + $0x10] sm:$0xf]  ;;  %v54_v15 = vadd.f32 %v53_v11, %v52_v10  ;;  %v57_v16 = vsel %vm51_vm0, %v345_v9, 0.0  ;;  %v92_v17 = vld [vmem:[%s475_s1] sm:$0xff] }
   0xb   :  { %114 = vmatpush.msra.mxu0 %v97_v2  ;;  %v363_v18 = vld [vmem:[#allocation2 + $0x14] sm:$0xf]  ;;  %v59_v20 = vsel %vm51_vm0, %v356_v14, 0.0  ;;  %v367_v21 = vld [vmem:[#allocation2 + $0x18] sm:$0xf] }
   0xc   :  { %v56_v19 = vadd.f32 %v55_v12, %v54_v15  ;;  %v61_v23 = vsel %vm51_vm0, %v363_v18, 0.0  ;;  %v371_v24 = vld [vmem:[#allocation2 + $0x1c] sm:$0xf]  ;;  %v63_v26 = vsel %vm51_vm0, %v367_v21, 0.0  ;;  %v375_v27 = vld [vmem:[#allocation2 + $0x20] sm:$0xf] }
   0xd   :  { %115 = vmatpush.msra.mxu0 %v96_v3  ;;  %v65_v29 = vsel %vm51_vm0, %v371_v24, 0.0  ;;  %v379_v30 = vld [vmem:[#allocation2 + $0x24] sm:$0xf]  ;;  %v67_v32 = vsel %vm51_vm0, %v375_v27, 0.0  ;;  %v383_v33 = vld [vmem:[#allocation2 + $0x28] sm:$0xf] }
   0xe   :  { %v58_v22 = vadd.f32 %v57_v16, %v56_v19  ;;  %v69_v35 = vsel %vm51_vm0, %v379_v30, 0.0  ;;  %v387_v36 = vld [vmem:[#allocation2 + $0x2c] sm:$0xf]  ;;  %v71_v38 = vsel %vm51_vm0, %v383_v33, 0.0  ;;  %v391_v39 = vld [vmem:[#allocation2 + $0x30] sm:$0xf] }
   0xf   :  { %116 = vmatpush.msra.mxu0 %v95_v4  ;;  %v73_v41 = vsel %vm51_vm0, %v387_v36, 0.0  ;;  %v395_v42 = vld [vmem:[#allocation2 + $0x34] sm:$0xf]  ;;  %v75_v44 = vsel %vm51_vm0, %v391_v39, 0.0  ;;  %v399_v45 = vld [vmem:[#allocation2 + $0x38] sm:$0xf] }
  0x10   :  { %v60_v25 = vadd.f32 %v59_v20, %v58_v22  ;;  %v77_v47 = vsel %vm51_vm0, %v395_v42, 0.0  ;;  %v403_v48 = vld [vmem:[#allocation2 + $0x3c] sm:$0xf]  ;;  %v79_v50 = vsel %vm51_vm0, %v399_v45, 0.0  ;;  %v407_v51 = vld [vmem:[#allocation2 + $0x40] sm:$0xf] }
  0x11   :  { %117 = vmatpush.msra.mxu0 %v94_v8  ;;  %v81_v53 = vsel %vm51_vm0, %v403_v48, 0.0  ;;  %v411_v54 = vld [vmem:[#allocation2 + $0x44] sm:$0xf]  ;;  %v83_v56 = vsel %vm51_vm0, %v407_v51, 0.0  ;;  %v415_v57 = vld [vmem:[#allocation2 + $0x48] sm:$0xf] }
  0x12   :  { %v62_v28 = vadd.f32 %v61_v23, %v60_v25  ;;  %v85_v59 = vsel %vm51_vm0, %v411_v54, 0.0  ;;  %v419_v60 = vld [vmem:[#allocation2 + $0x4c] sm:$0xf]  ;;  %v87_v62 = vsel %vm51_vm0, %v415_v57, 0.0  ;;  %v125_v4 = vld [vmem:[%s476_s2] sm:$0xff]  ;;  %s294_s2 = smov [#allocation5]  }
  0x13   :  { %118 = vmatpush.msra.mxu0 %v93_v13  ;;  %v89_v0 = vsel %vm51_vm0, %v419_v60, 0.0  ;;  %145 = vmatpush.msra.mxu1 %v125_v4  ;;  %s213_s8 = sshll.u32 %s294_s2, 4  ;;  %s214_s8 = int_to_ptr.vmem [resolvable:$true] %s213_s8 }
  0x14   :  { %v64_v31 = vadd.f32 %v63_v26, %v62_v28 }
  0x15   :  { %119 = vmatpush.msra.mxu0 %v92_v17 }
  0x16   :  { %v66_v34 = vadd.f32 %v65_v29, %v64_v31 }
  0x18   :  { %v68_v37 = vadd.f32 %v67_v32, %v66_v34 }
  0x1a   :  { %v70_v40 = vadd.f32 %v69_v35, %v68_v37 }
  0x1c   :  { %v72_v43 = vadd.f32 %v71_v38, %v70_v40 }
  0x1e   :  { %v74_v46 = vadd.f32 %v73_v41, %v72_v43 }
  0x20   :  { %v76_v49 = vadd.f32 %v75_v44, %v74_v46 }
  0x22   :  { %v78_v52 = vadd.f32 %v77_v47, %v76_v49 }
  0x24   :  { %v80_v55 = vadd.f32 %v79_v50, %v78_v52 }
  0x26   :  { %v82_v58 = vadd.f32 %v81_v53, %v80_v55 }
  0x28   :  { %v84_v61 = vadd.f32 %v83_v56, %v82_v58 }
  0x2a   :  { %v86_v63 = vadd.f32 %v85_v59, %v84_v61 }
  0x2c   :  { %v88_v1 = vadd.f32 %v87_v62, %v86_v63 }
  0x2e   :  { %v90_v2 = vadd.f32 %v89_v0, %v88_v1 }
  0x30   :  { %v91_v3 = vmul.f32 0.05, %v90_v2 }
  0x32   :  { %228 = vmatmul.msk.f32.vlgmr.msra.gmra.mxu0 %vm100_vm1, %v91_v3 }
  0xaf   :  { %v121_v8 = vpop.f32.mrf.mxu0 }
  0xb0   :  { %v124_v10 = vmax.f32 %v121_v8, 0.0 }
  0xb2   :  { %229 = vmatmul.msk.f32.vlgmr.msra.gmra.mxu1 %vm126_vm2, %v124_v10 }
 0x12f   :  { %v147_v11 = vpop.f32.mrf.mxu1 }
 0x130   :  { %v230_v12 = vmul.f32 -1.442695, %v147_v11 }
 0x132   :  { %235 = vpow2.f32 %v230_v12 }
 0x138   :  { %v236_v13 = vpop.eup %235 }
 0x139   :  { %v153_v15 = vadd.f32 1.0, %v236_v13 }
 0x13b   :  { %237 = vrcp.f32 %v153_v15  ;;  %v165_v20 = vand.u32 2147483648, %v153_v15  ;;  %v163_v23 = vand.u32 2147483647, %v153_v15  ;;  %vm159_vm4 = vweird.f32 %v153_v15 }
 0x13d   :  { %v166_v26 = vor.u32 1.1754944e-38, %v165_v20  ;;  %vm164_vm6 = vcmp.eq.f32.partialorder %v163_v23, 8.507059e+37 }
 0x141   :  { %v238_v16 = vpop.eup %237 }
 0x142   :  { %v155_v17 = vmul.f32 %v238_v16, %v153_v15  ;;  %vm160_vm3 = vweird.f32 %v238_v16 }
 0x143   :  { %vm161_vm5 = vmor %vm159_vm4, %vm160_vm3 }
 0x144   :  { %v156_v19 = vsub.f32 1.0, %v155_v17 }
 0x146   :  { %v157_v22 = vmul.f32 %v238_v16, %v156_v19 }
 0x148   :  { %v158_v25 = vadd.f32 %v238_v16, %v157_v22 }
 0x14a   :  { %v162_v28 = vsel %vm161_vm5, %v238_v16, %v158_v25 }
 0x14b   :  { %v167_v29 = vsel %vm164_vm6, %v166_v26, %v162_v28 }
 0x14c   :  { %v169_v31 = vmul.f32 %v167_v29, %v336_v5  ;;  %v170_v32 = vmul.f32 %v167_v29, %v338_v6  ;;  %v171_v34 = vmul.f32 %v167_v29, %v340_v7  ;;  %v172_v35 = vmul.f32 %v167_v29, %v345_v9 }
 0x14d   :  { %v173_v37 = vmul.f32 %v167_v29, %v356_v14  ;;  %v174_v38 = vmul.f32 %v167_v29, %v363_v18  ;;  %v175_v40 = vmul.f32 %v167_v29, %v367_v21  ;;  %v176_v5 = vmul.f32 %v167_v29, %v371_v24 }
 0x14e   :  { %189 = vst.msk [vmem:[#allocation5] sm:$0xf] %vm51_vm0, %v169_v31  ;;  %v177_v6 = vmul.f32 %v167_v29, %v375_v27  ;;  %v178_v7 = vmul.f32 %v167_v29, %v379_v30  ;;  %v179_v9 = vmul.f32 %v167_v29, %v383_v33  ;;  %v180_v14 = vmul.f32 %v167_v29, %v387_v36 }
 0x14f   :  { %190 = vst.msk [vmem:[#allocation5 + $0x4] sm:$0xf] %vm51_vm0, %v170_v32  ;;  %v181_v18 = vmul.f32 %v167_v29, %v391_v39  ;;  %v182_v21 = vmul.f32 %v167_v29, %v395_v42  ;;  %v183_v24 = vmul.f32 %v167_v29, %v399_v45  ;;  %v184_v27 = vmul.f32 %v167_v29, %v403_v48 }
 0x150   :  { %191 = vst.msk [vmem:[#allocation5 + $0x8] sm:$0xf] %vm51_vm0, %v171_v34  ;;  %v185_v30 = vmul.f32 %v167_v29, %v407_v51  ;;  %v186_v33 = vmul.f32 %v167_v29, %v411_v54  ;;  %v187_v36 = vmul.f32 %v167_v29, %v415_v57  ;;  %v188_v39 = vmul.f32 %v167_v29, %v419_v60 }
 0x151   :  { %192 = vst.msk [vmem:[#allocation5 + $0xc] sm:$0xf] %vm51_vm0, %v172_v35 }
 0x152   :  { %193 = vst.msk [vmem:[#allocation5 + $0x10] sm:$0xf] %vm51_vm0, %v173_v37 }
 0x153   :  { %194 = vst.msk [vmem:[#allocation5 + $0x14] sm:$0xf] %vm51_vm0, %v174_v38 }
 0x154   :  { %195 = vst.msk [vmem:[#allocation5 + $0x18] sm:$0xf] %vm51_vm0, %v175_v40 }
 0x155   :  { %196 = vst.msk [vmem:[#allocation5 + $0x1c] sm:$0xf] %vm51_vm0, %v176_v5 }
 0x156   :  { %197 = vst.msk [vmem:[#allocation5 + $0x20] sm:$0xf] %vm51_vm0, %v177_v6 }
 0x157   :  { %198 = vst.msk [vmem:[#allocation5 + $0x24] sm:$0xf] %vm51_vm0, %v178_v7 }
 0x158   :  { %199 = vst.msk [vmem:[#allocation5 + $0x28] sm:$0xf] %vm51_vm0, %v179_v9 }
 0x159   :  { %200 = vst.msk [vmem:[#allocation5 + $0x2c] sm:$0xf] %vm51_vm0, %v180_v14 }
 0x15a   :  { %201 = vst.msk [vmem:[#allocation5 + $0x30] sm:$0xf] %vm51_vm0, %v181_v18 }
 0x15b   :  { %202 = vst.msk [vmem:[#allocation5 + $0x34] sm:$0xf] %vm51_vm0, %v182_v21 }
 0x15c   :  { %203 = vst.msk [vmem:[#allocation5 + $0x38] sm:$0xf] %vm51_vm0, %v183_v24 }
 0x15d   :  { %204 = vst.msk [vmem:[#allocation5 + $0x3c] sm:$0xf] %vm51_vm0, %v184_v27 }
 0x15e   :  { %205 = vst.msk [vmem:[#allocation5 + $0x40] sm:$0xf] %vm51_vm0, %v185_v30 }
 0x15f   :  { %206 = vst.msk [vmem:[#allocation5 + $0x44] sm:$0xf] %vm51_vm0, %v186_v33 }
 0x160   :  { %207 = vst.msk [vmem:[#allocation5 + $0x48] sm:$0xf] %vm51_vm0, %v187_v36 }
 0x161   :  { %208 = vst.msk [vmem:[#allocation5 + $0x4c] sm:$0xf] %vm51_vm0, %v188_v39 }
 0x162   :  { %221 = dma.vmem_to_hbm [thread:$0]  %s214_s8, 1280, %s216_s11, [#allocation4], %s292_s17, %s292_s17, %s293_s18  }
 0x163   :  { %289 = dma.done.wait [#allocation4], 1280  }
 0x164   :  { %290 = vsyncadd [#allocation4], 4294966016 }
 0x165   :  { %226 = vsyncpa [#allocation3], 1 }
 0x166   :  { %227 = vsyncpa [#allocation4], 1 }

</bundles_post_ra>
